<compile_context>
chip_gen: v7x
topology: tpu7x:2x2x1
jax: 0.10.0
libtpu: 0.0.40
codegen_flags: <defaults>
</compile_context>

<pallas_src>
import jax
import jax.numpy as jnp
from jax.experimental import pallas as pl
from jax.experimental.pallas import tpu as pltpu


def mha_kernel(x_ref, bias_ref,
               wq_ref, bq_ref, wk_ref, bk_ref, wv_ref, bv_ref,
               wo_ref, bo_ref,
               out_ref):
    """One batch element per grid step.

    x_ref:    (1, S, E)   compute dtype (bf16 or f32)
    bias_ref: (1, S, S)   additive mask bias (-1e9 / 0), bf16
    wq/wk/wv: (E, H*Dh)   packed, compute dtype
    bq/bk/bv: (1, H*Dh)   f32
    wo_ref:   (H, Dh, E)  compute dtype
    bo_ref:   (1, E)      f32
    out_ref:  (1, S, E)   f32
    """
    f32 = jnp.float32
    x = x_ref[0]                            # (S, E)
    bias = bias_ref[0].astype(f32)          # (S, S), hoisted out of head loop

    H, Dh, E = wo_ref.shape
    S = x.shape[0]
    cdt = x.dtype
    scale = 1.0 / (float(Dh) ** 0.5)

    # Fused lane-dense projections: one (S,E)@(E,H*Dh) MXU matmul per Q/K/V,
    # f32 accumulation, bias added in f32.
    q = jnp.dot(x, wq_ref[...], preferred_element_type=f32) + bq_ref[...]
    k = jnp.dot(x, wk_ref[...], preferred_element_type=f32) + bk_ref[...]
    v = jnp.dot(x, wv_ref[...], preferred_element_type=f32) + bv_ref[...]
    q = (q * scale).astype(cdt)             # fold 1/sqrt(Dh) into Q once
    k = k.astype(cdt)
    v = v.astype(cdt)

    acc = jnp.zeros((S, E), dtype=f32)
    for h in range(H):                      # static unroll over heads
        sl = slice(h * Dh, (h + 1) * Dh)
        q_h = q[:, sl]
        k_h = k[:, sl]
        v_h = v[:, sl]

        # scores = Q_h K_h^T without materializing k_h.T
        s = jax.lax.dot_general(
            q_h, k_h,
            dimension_numbers=(((1,), (1,)), ((), ())),
            preferred_element_type=f32)     # (S, S)
        s = s + bias                        # additive mask bias (precomputed)

        # Numerically stable softmax; normalization deferred past the PV matmul.
        s = s - jnp.max(s, axis=-1, keepdims=True)
        e = jnp.exp(s)
        inv_l = pl.reciprocal(jnp.sum(e, axis=-1, keepdims=True), approx=True)

        ctx = jnp.dot(e.astype(cdt), v_h,
                      preferred_element_type=f32) * inv_l       # (S, Dh)

        # concat(ctx_0..ctx_{H-1}) @ Wo  ==  sum_h ctx_h @ Wo[h]
        acc = acc + jnp.dot(ctx.astype(cdt), wo_ref[h],
                            preferred_element_type=f32)         # (S, E)

    out_ref[0] = (acc + bo_ref[...]).astype(out_ref.dtype)


def multi_head_attention(x, mask, params, *, compute_dtype=jnp.bfloat16):
    """x: (B, S, E) float32, mask: (B, S, S) float32 (0/1).

    params: per-head weights as in the torch module:
      wq/wk/wv: (H, E, Dh), bq/bk/bv: (H, 1, Dh), wo: (E, E), bo: (1, E).
    """
    B, S, E = x.shape
    wq, bq, wk, bk, wv, bv, wo, bo = params
    H, _, Dh = wq.shape

    # Pack per-head projection weights into lane-dense (E, H*Dh) matrices and
    # flat (1, H*Dh) biases; reshape Wo to (H, Dh, E) so concat+projection
    # folds into a per-head accumulation inside the kernel.
    def pack_w(w):
        return jnp.transpose(w, (1, 0, 2)).reshape(E, H * Dh).astype(compute_dtype)

    def pack_b(b):
        return b.reshape(1, H * Dh).astype(jnp.float32)

    wq_p, wk_p, wv_p = pack_w(wq), pack_w(wk), pack_w(wv)
    bq_p, bk_p, bv_p = pack_b(bq), pack_b(bk), pack_b(bv)
    wo_p = wo.reshape(H, Dh, E).astype(compute_dtype)
    bo_p = bo.reshape(1, E).astype(jnp.float32)

    x_c = x.astype(compute_dtype)
    # Additive attention-mask bias, computed once (not per head) and shipped
    # as bf16 to halve the S^2 HBM stream relative to the f32 0/1 mask.
    mask_bias = jnp.where(mask == 0, -1e9, 0.0).astype(jnp.bfloat16)

    full2 = lambda: pl.BlockSpec((E, H * Dh), lambda b: (0, 0))
    bias2 = lambda: pl.BlockSpec((1, H * Dh), lambda b: (0, 0))

    return pl.pallas_call(
        mha_kernel,
        out_shape=jax.ShapeDtypeStruct((B, S, E), jnp.float32),
        grid=(B,),
        in_specs=[
            pl.BlockSpec((1, S, E), lambda b: (b, 0, 0)),      # x
            pl.BlockSpec((1, S, S), lambda b: (b, 0, 0)),      # mask bias
            full2(),                                           # wq packed
            bias2(),                                           # bq packed
            full2(),                                           # wk packed
            bias2(),                                           # bk packed
            full2(),                                           # wv packed
            bias2(),                                           # bv packed
            pl.BlockSpec((H, Dh, E), lambda b: (0, 0, 0)),     # wo (H, Dh, E)
            pl.BlockSpec((1, E), lambda b: (0, 0)),            # bo
        ],
        out_specs=pl.BlockSpec((1, S, E), lambda b: (b, 0, 0)),
        compiler_params=pltpu.CompilerParams(
            dimension_semantics=("parallel",)),
    )(x_c, mask_bias, wq_p, bq_p, wk_p, bk_p, wv_p, bv_p, wo_p, bo_p)


def reference_mha(x, mask, params):
    """Pure-JAX f32 reference of the same forward pass."""
    wq, bq, wk, bk, wv, bv, wo, bo = params
    H, _, Dh = wq.shape
    scale = 1.0 / jnp.sqrt(jnp.float32(Dh))
    heads = []
    for h in range(H):
        q = x @ wq[h] + bq[h]
        k = x @ wk[h] + bk[h]
        v = x @ wv[h] + bv[h]
        s = jnp.einsum("bqd,bkd->bqk", q, k) * scale
        s = jnp.where(mask == 0, -1e9, s)
        w = jax.nn.softmax(s, axis=-1)
        heads.append(jnp.einsum("bqk,bkd->bqd", w, v))
    concat = jnp.concatenate(heads, axis=-1)
    return concat @ wo + bo[0]


if __name__ == "__main__":
    # Small shapes consistent with the module: embedding_dim=32, heads=4 -> head_dim=8.
    B, S, E, H = 2, 8, 32, 4
    Dh = E // H

    key = jax.random.PRNGKey(0)
    ks = jax.random.split(key, 10)

    x = jax.random.normal(ks[0], (B, S, E), dtype=jnp.float32)
    # 0/1 mask; keep the diagonal unmasked so no row is fully masked (NaN guard).
    mask = (jax.random.uniform(ks[1], (B, S, S)) > 0.3).astype(jnp.float32)
    mask = jnp.maximum(mask, jnp.eye(S, dtype=jnp.float32)[None, :, :])

    def init(k, shape, scale=0.1):
        return scale * jax.random.normal(k, shape, dtype=jnp.float32)

    params = (
        init(ks[2], (H, E, Dh)),   # wq  (per-head, stored as (in, out))
        init(ks[3], (H, 1, Dh)),   # bq
        init(ks[4], (H, E, Dh)),   # wk
        init(ks[5], (H, 1, Dh)),   # bk
        init(ks[6], (H, E, Dh)),   # wv
        init(ks[7], (H, 1, Dh)),   # bv
        init(ks[8], (E, E)),       # wo  (in, out)
        init(ks[9], (1, E)),       # bo
    )

    ref = reference_mha(x, mask, params)

    # f32 MXU path: tight semantic check against the pure-JAX reference
    # (slightly loosened for the approximate EUP reciprocal).
    out_f32 = jax.block_until_ready(
        multi_head_attention(x, mask, params, compute_dtype=jnp.float32))
    assert out_f32.shape == (B, S, E)
    assert jnp.allclose(out_f32, ref, atol=2e-3, rtol=2e-3), "f32 path mismatch"

    # bf16-input MXU path (production path on v5e/v6e/v7x, f32 accumulation,
    # matching the torch fp16 custom_fwd intent).
    out_bf16 = jax.block_until_ready(
        multi_head_attention(x, mask, params, compute_dtype=jnp.bfloat16))
    assert out_bf16.shape == (B, S, E)
    assert jnp.allclose(out_bf16, ref, atol=5e-2, rtol=5e-2), "bf16 path mismatch"

    print("KERNEL_OK")
</pallas_src>

<mosaic_0001>
module attributes {stable_mosaic.version = 11 : i64} {
  func.func @mha_kernel(%arg0: i32, %arg1: memref<1x8x32xf32, #tpu.memory_space<vmem>>, %arg2: memref<1x8x8xbf16, #tpu.memory_space<vmem>>, %arg3: memref<32x32xf32, #tpu.memory_space<vmem>>, %arg4: memref<1x32xf32, #tpu.memory_space<vmem>>, %arg5: memref<32x32xf32, #tpu.memory_space<vmem>>, %arg6: memref<1x32xf32, #tpu.memory_space<vmem>>, %arg7: memref<32x32xf32, #tpu.memory_space<vmem>>, %arg8: memref<1x32xf32, #tpu.memory_space<vmem>>, %arg9: memref<4x8x32xf32, #tpu.memory_space<vmem>>, %arg10: memref<1x32xf32, #tpu.memory_space<vmem>>, %arg11: memref<1x8x32xf32, #tpu.memory_space<vmem>>) attributes {dimension_semantics = [#tpu.dimension_semantics<parallel>], iteration_bounds = array<i64: 2>, scalar_prefetch = 0 : i64, scratch_operands = 0 : i64, tpu.core_type = #tpu.core_type<tc>, window_params = [{transform_indices = @transform_0, window_bounds = array<i64: 1, 8, 32>}, {transform_indices = @transform_1, window_bounds = array<i64: 1, 8, 8>}, {pipeline_mode = #tpu.pipeline_mode<synchronous>, transform_indices = @transform_2, window_bounds = array<i64: 32, 32>}, {pipeline_mode = #tpu.pipeline_mode<synchronous>, transform_indices = @transform_3, window_bounds = array<i64: 1, 32>}, {pipeline_mode = #tpu.pipeline_mode<synchronous>, transform_indices = @transform_4, window_bounds = array<i64: 32, 32>}, {pipeline_mode = #tpu.pipeline_mode<synchronous>, transform_indices = @transform_5, window_bounds = array<i64: 1, 32>}, {pipeline_mode = #tpu.pipeline_mode<synchronous>, transform_indices = @transform_6, window_bounds = array<i64: 32, 32>}, {pipeline_mode = #tpu.pipeline_mode<synchronous>, transform_indices = @transform_7, window_bounds = array<i64: 1, 32>}, {pipeline_mode = #tpu.pipeline_mode<synchronous>, transform_indices = @transform_8, window_bounds = array<i64: 4, 8, 32>}, {pipeline_mode = #tpu.pipeline_mode<synchronous>, transform_indices = @transform_9, window_bounds = array<i64: 1, 32>}, {transform_indices = @transform_10, window_bounds = array<i64: 1, 8, 32>}]} {
    %c0 = arith.constant 0 : index
    %c0_0 = arith.constant 0 : index
    %c0_1 = arith.constant 0 : index
    %0 = vector.load %arg1[%c0, %c0_0, %c0_1] : memref<1x8x32xf32, #tpu.memory_space<vmem>>, vector<1x8x32xf32>
    %1 = vector.shape_cast %0 : vector<1x8x32xf32> to vector<8x32xf32>
    %c0_2 = arith.constant 0 : index
    %c0_3 = arith.constant 0 : index
    %c0_4 = arith.constant 0 : index
    %2 = vector.load %arg2[%c0_2, %c0_3, %c0_4] : memref<1x8x8xbf16, #tpu.memory_space<vmem>>, vector<1x8x8xbf16>
    %3 = vector.shape_cast %2 : vector<1x8x8xbf16> to vector<8x8xbf16>
    %4 = arith.extf %3 : vector<8x8xbf16> to vector<8x8xf32>
    %c0_5 = arith.constant 0 : index
    %c0_6 = arith.constant 0 : index
    %5 = vector.load %arg3[%c0_5, %c0_6] : memref<32x32xf32, #tpu.memory_space<vmem>>, vector<32x32xf32>
    %cst = arith.constant dense<0.000000e+00> : vector<8x32xf32>
    %6 = tpu.matmul %1, %5, %cst {dimension_numbers = #tpu.dot_dimension_numbers<[1], [0], [0], [1], [0, 0, 1, 1], [], []>} : vector<8x32xf32>, vector<32x32xf32>, vector<8x32xf32> -> vector<8x32xf32>
    %c0_7 = arith.constant 0 : index
    %c0_8 = arith.constant 0 : index
    %7 = vector.load %arg4[%c0_7, %c0_8] : memref<1x32xf32, #tpu.memory_space<vmem>>, vector<1x32xf32>
    %8 = vector.broadcast %7 : vector<1x32xf32> to vector<8x32xf32>
    %9 = arith.addf %6, %8 : vector<8x32xf32>
    %c0_9 = arith.constant 0 : index
    %c0_10 = arith.constant 0 : index
    %10 = vector.load %arg5[%c0_9, %c0_10] : memref<32x32xf32, #tpu.memory_space<vmem>>, vector<32x32xf32>
    %cst_11 = arith.constant dense<0.000000e+00> : vector<8x32xf32>
    %11 = tpu.matmul %1, %10, %cst_11 {dimension_numbers = #tpu.dot_dimension_numbers<[1], [0], [0], [1], [0, 0, 1, 1], [], []>} : vector<8x32xf32>, vector<32x32xf32>, vector<8x32xf32> -> vector<8x32xf32>
    %c0_12 = arith.constant 0 : index
    %c0_13 = arith.constant 0 : index
    %12 = vector.load %arg6[%c0_12, %c0_13] : memref<1x32xf32, #tpu.memory_space<vmem>>, vector<1x32xf32>
    %13 = vector.broadcast %12 : vector<1x32xf32> to vector<8x32xf32>
    %14 = arith.addf %11, %13 : vector<8x32xf32>
    %c0_14 = arith.constant 0 : index
    %c0_15 = arith.constant 0 : index
    %15 = vector.load %arg7[%c0_14, %c0_15] : memref<32x32xf32, #tpu.memory_space<vmem>>, vector<32x32xf32>
    %cst_16 = arith.constant dense<0.000000e+00> : vector<8x32xf32>
    %16 = tpu.matmul %1, %15, %cst_16 {dimension_numbers = #tpu.dot_dimension_numbers<[1], [0], [0], [1], [0, 0, 1, 1], [], []>} : vector<8x32xf32>, vector<32x32xf32>, vector<8x32xf32> -> vector<8x32xf32>
    %c0_17 = arith.constant 0 : index
    %c0_18 = arith.constant 0 : index
    %17 = vector.load %arg8[%c0_17, %c0_18] : memref<1x32xf32, #tpu.memory_space<vmem>>, vector<1x32xf32>
    %18 = vector.broadcast %17 : vector<1x32xf32> to vector<8x32xf32>
    %19 = arith.addf %16, %18 : vector<8x32xf32>
    %cst_19 = arith.constant 0.353553385 : f32
    %20 = vector.broadcast %cst_19 : f32 to vector<8x32xf32>
    %21 = arith.mulf %9, %20 : vector<8x32xf32>
    %cst_20 = arith.constant 0.000000e+00 : f32
    %22 = vector.broadcast %cst_20 : f32 to vector<8x32xf32>
    %23 = vector.extract_strided_slice %21 {offsets = [0, 0], sizes = [8, 8], strides = [1, 1]} : vector<8x32xf32> to vector<8x8xf32>
    %24 = vector.extract_strided_slice %14 {offsets = [0, 0], sizes = [8, 8], strides = [1, 1]} : vector<8x32xf32> to vector<8x8xf32>
    %25 = vector.extract_strided_slice %19 {offsets = [0, 0], sizes = [8, 8], strides = [1, 1]} : vector<8x32xf32> to vector<8x8xf32>
    %cst_21 = arith.constant dense<0.000000e+00> : vector<8x8xf32>
    %26 = tpu.matmul %23, %24, %cst_21 {dimension_numbers = #tpu.dot_dimension_numbers<[1], [1], [0], [0], [0, 0, 1, 0], [], []>} : vector<8x8xf32>, vector<8x8xf32>, vector<8x8xf32> -> vector<8x8xf32>
    %27 = arith.addf %26, %4 : vector<8x8xf32>
    %cst_22 = arith.constant dense<0xFF800000> : vector<8xf32>
    %28 = vector.multi_reduction <maximumf>, %27, %cst_22 [1] : vector<8x8xf32> to vector<8xf32>
    %29 = vector.shape_cast %28 : vector<8xf32> to vector<8x1xf32>
    %30 = vector.broadcast %29 : vector<8x1xf32> to vector<8x8xf32>
    %31 = arith.subf %27, %30 : vector<8x8xf32>
    %32 = math.exp %31 : vector<8x8xf32>
    %cst_23 = arith.constant dense<0.000000e+00> : vector<8xf32>
    %33 = vector.multi_reduction <add>, %32, %cst_23 [1] : vector<8x8xf32> to vector<8xf32>
    %34 = vector.shape_cast %33 : vector<8xf32> to vector<8x1xf32>
    %35 = tpu.reciprocal %34 {approx = true} : vector<8x1xf32> -> vector<8x1xf32>
    %cst_24 = arith.constant dense<0.000000e+00> : vector<8x8xf32>
    %36 = tpu.matmul %32, %25, %cst_24 {dimension_numbers = #tpu.dot_dimension_numbers<[1], [0], [0], [1], [0, 0, 1, 1], [], []>} : vector<8x8xf32>, vector<8x8xf32>, vector<8x8xf32> -> vector<8x8xf32>
    %37 = vector.broadcast %35 : vector<8x1xf32> to vector<8x8xf32>
    %38 = arith.mulf %36, %37 : vector<8x8xf32>
    %c0_25 = arith.constant 0 : index
    %c0_26 = arith.constant 0 : index
    %c0_27 = arith.constant 0 : index
    %39 = vector.load %arg9[%c0_25, %c0_26, %c0_27] : memref<4x8x32xf32, #tpu.memory_space<vmem>>, vector<1x8x32xf32>
    %40 = vector.shape_cast %39 : vector<1x8x32xf32> to vector<8x32xf32>
    %cst_28 = arith.constant dense<0.000000e+00> : vector<8x32xf32>
    %41 = tpu.matmul %38, %40, %cst_28 {dimension_numbers = #tpu.dot_dimension_numbers<[1], [0], [0], [1], [0, 0, 1, 1], [], []>} : vector<8x8xf32>, vector<8x32xf32>, vector<8x32xf32> -> vector<8x32xf32>
    %42 = arith.addf %22, %41 : vector<8x32xf32>
    %43 = vector.extract_strided_slice %21 {offsets = [0, 8], sizes = [8, 8], strides = [1, 1]} : vector<8x32xf32> to vector<8x8xf32>
    %44 = vector.extract_strided_slice %14 {offsets = [0, 8], sizes = [8, 8], strides = [1, 1]} : vector<8x32xf32> to vector<8x8xf32>
    %45 = vector.extract_strided_slice %19 {offsets = [0, 8], sizes = [8, 8], strides = [1, 1]} : vector<8x32xf32> to vector<8x8xf32>
    %cst_29 = arith.constant dense<0.000000e+00> : vector<8x8xf32>
    %46 = tpu.matmul %43, %44, %cst_29 {dimension_numbers = #tpu.dot_dimension_numbers<[1], [1], [0], [0], [0, 0, 1, 0], [], []>} : vector<8x8xf32>, vector<8x8xf32>, vector<8x8xf32> -> vector<8x8xf32>
    %47 = arith.addf %46, %4 : vector<8x8xf32>
    %cst_30 = arith.constant dense<0xFF800000> : vector<8xf32>
    %48 = vector.multi_reduction <maximumf>, %47, %cst_30 [1] : vector<8x8xf32> to vector<8xf32>
    %49 = vector.shape_cast %48 : vector<8xf32> to vector<8x1xf32>
    %50 = vector.broadcast %49 : vector<8x1xf32> to vector<8x8xf32>
    %51 = arith.subf %47, %50 : vector<8x8xf32>
    %52 = math.exp %51 : vector<8x8xf32>
    %cst_31 = arith.constant dense<0.000000e+00> : vector<8xf32>
    %53 = vector.multi_reduction <add>, %52, %cst_31 [1] : vector<8x8xf32> to vector<8xf32>
    %54 = vector.shape_cast %53 : vector<8xf32> to vector<8x1xf32>
    %55 = tpu.reciprocal %54 {approx = true} : vector<8x1xf32> -> vector<8x1xf32>
    %cst_32 = arith.constant dense<0.000000e+00> : vector<8x8xf32>
    %56 = tpu.matmul %52, %45, %cst_32 {dimension_numbers = #tpu.dot_dimension_numbers<[1], [0], [0], [1], [0, 0, 1, 1], [], []>} : vector<8x8xf32>, vector<8x8xf32>, vector<8x8xf32> -> vector<8x8xf32>
    %57 = vector.broadcast %55 : vector<8x1xf32> to vector<8x8xf32>
    %58 = arith.mulf %56, %57 : vector<8x8xf32>
    %c1 = arith.constant 1 : index
    %c0_33 = arith.constant 0 : index
    %c0_34 = arith.constant 0 : index
    %59 = vector.load %arg9[%c1, %c0_33, %c0_34] : memref<4x8x32xf32, #tpu.memory_space<vmem>>, vector<1x8x32xf32>
    %60 = vector.shape_cast %59 : vector<1x8x32xf32> to vector<8x32xf32>
    %cst_35 = arith.constant dense<0.000000e+00> : vector<8x32xf32>
    %61 = tpu.matmul %58, %60, %cst_35 {dimension_numbers = #tpu.dot_dimension_numbers<[1], [0], [0], [1], [0, 0, 1, 1], [], []>} : vector<8x8xf32>, vector<8x32xf32>, vector<8x32xf32> -> vector<8x32xf32>
    %62 = arith.addf %42, %61 : vector<8x32xf32>
    %63 = vector.extract_strided_slice %21 {offsets = [0, 16], sizes = [8, 8], strides = [1, 1]} : vector<8x32xf32> to vector<8x8xf32>
    %64 = vector.extract_strided_slice %14 {offsets = [0, 16], sizes = [8, 8], strides = [1, 1]} : vector<8x32xf32> to vector<8x8xf32>
    %65 = vector.extract_strided_slice %19 {offsets = [0, 16], sizes = [8, 8], strides = [1, 1]} : vector<8x32xf32> to vector<8x8xf32>
    %cst_36 = arith.constant dense<0.000000e+00> : vector<8x8xf32>
    %66 = tpu.matmul %63, %64, %cst_36 {dimension_numbers = #tpu.dot_dimension_numbers<[1], [1], [0], [0], [0, 0, 1, 0], [], []>} : vector<8x8xf32>, vector<8x8xf32>, vector<8x8xf32> -> vector<8x8xf32>
    %67 = arith.addf %66, %4 : vector<8x8xf32>
    %cst_37 = arith.constant dense<0xFF800000> : vector<8xf32>
    %68 = vector.multi_reduction <maximumf>, %67, %cst_37 [1] : vector<8x8xf32> to vector<8xf32>
    %69 = vector.shape_cast %68 : vector<8xf32> to vector<8x1xf32>
    %70 = vector.broadcast %69 : vector<8x1xf32> to vector<8x8xf32>
    %71 = arith.subf %67, %70 : vector<8x8xf32>
    %72 = math.exp %71 : vector<8x8xf32>
    %cst_38 = arith.constant dense<0.000000e+00> : vector<8xf32>
    %73 = vector.multi_reduction <add>, %72, %cst_38 [1] : vector<8x8xf32> to vector<8xf32>
    %74 = vector.shape_cast %73 : vector<8xf32> to vector<8x1xf32>
    %75 = tpu.reciprocal %74 {approx = true} : vector<8x1xf32> -> vector<8x1xf32>
    %cst_39 = arith.constant dense<0.000000e+00> : vector<8x8xf32>
    %76 = tpu.matmul %72, %65, %cst_39 {dimension_numbers = #tpu.dot_dimension_numbers<[1], [0], [0], [1], [0, 0, 1, 1], [], []>} : vector<8x8xf32>, vector<8x8xf32>, vector<8x8xf32> -> vector<8x8xf32>
    %77 = vector.broadcast %75 : vector<8x1xf32> to vector<8x8xf32>
    %78 = arith.mulf %76, %77 : vector<8x8xf32>
    %c2 = arith.constant 2 : index
    %c0_40 = arith.constant 0 : index
    %c0_41 = arith.constant 0 : index
    %79 = vector.load %arg9[%c2, %c0_40, %c0_41] : memref<4x8x32xf32, #tpu.memory_space<vmem>>, vector<1x8x32xf32>
    %80 = vector.shape_cast %79 : vector<1x8x32xf32> to vector<8x32xf32>
    %cst_42 = arith.constant dense<0.000000e+00> : vector<8x32xf32>
    %81 = tpu.matmul %78, %80, %cst_42 {dimension_numbers = #tpu.dot_dimension_numbers<[1], [0], [0], [1], [0, 0, 1, 1], [], []>} : vector<8x8xf32>, vector<8x32xf32>, vector<8x32xf32> -> vector<8x32xf32>
    %82 = arith.addf %62, %81 : vector<8x32xf32>
    %83 = vector.extract_strided_slice %21 {offsets = [0, 24], sizes = [8, 8], strides = [1, 1]} : vector<8x32xf32> to vector<8x8xf32>
    %84 = vector.extract_strided_slice %14 {offsets = [0, 24], sizes = [8, 8], strides = [1, 1]} : vector<8x32xf32> to vector<8x8xf32>
    %85 = vector.extract_strided_slice %19 {offsets = [0, 24], sizes = [8, 8], strides = [1, 1]} : vector<8x32xf32> to vector<8x8xf32>
    %cst_43 = arith.constant dense<0.000000e+00> : vector<8x8xf32>
    %86 = tpu.matmul %83, %84, %cst_43 {dimension_numbers = #tpu.dot_dimension_numbers<[1], [1], [0], [0], [0, 0, 1, 0], [], []>} : vector<8x8xf32>, vector<8x8xf32>, vector<8x8xf32> -> vector<8x8xf32>
    %87 = arith.addf %86, %4 : vector<8x8xf32>
    %cst_44 = arith.constant dense<0xFF800000> : vector<8xf32>
    %88 = vector.multi_reduction <maximumf>, %87, %cst_44 [1] : vector<8x8xf32> to vector<8xf32>
    %89 = vector.shape_cast %88 : vector<8xf32> to vector<8x1xf32>
    %90 = vector.broadcast %89 : vector<8x1xf32> to vector<8x8xf32>
    %91 = arith.subf %87, %90 : vector<8x8xf32>
    %92 = math.exp %91 : vector<8x8xf32>
    %cst_45 = arith.constant dense<0.000000e+00> : vector<8xf32>
    %93 = vector.multi_reduction <add>, %92, %cst_45 [1] : vector<8x8xf32> to vector<8xf32>
    %94 = vector.shape_cast %93 : vector<8xf32> to vector<8x1xf32>
    %95 = tpu.reciprocal %94 {approx = true} : vector<8x1xf32> -> vector<8x1xf32>
    %cst_46 = arith.constant dense<0.000000e+00> : vector<8x8xf32>
    %96 = tpu.matmul %92, %85, %cst_46 {dimension_numbers = #tpu.dot_dimension_numbers<[1], [0], [0], [1], [0, 0, 1, 1], [], []>} : vector<8x8xf32>, vector<8x8xf32>, vector<8x8xf32> -> vector<8x8xf32>
    %97 = vector.broadcast %95 : vector<8x1xf32> to vector<8x8xf32>
    %98 = arith.mulf %96, %97 : vector<8x8xf32>
    %c3 = arith.constant 3 : index
    %c0_47 = arith.constant 0 : index
    %c0_48 = arith.constant 0 : index
    %99 = vector.load %arg9[%c3, %c0_47, %c0_48] : memref<4x8x32xf32, #tpu.memory_space<vmem>>, vector<1x8x32xf32>
    %100 = vector.shape_cast %99 : vector<1x8x32xf32> to vector<8x32xf32>
    %cst_49 = arith.constant dense<0.000000e+00> : vector<8x32xf32>
    %101 = tpu.matmul %98, %100, %cst_49 {dimension_numbers = #tpu.dot_dimension_numbers<[1], [0], [0], [1], [0, 0, 1, 1], [], []>} : vector<8x8xf32>, vector<8x32xf32>, vector<8x32xf32> -> vector<8x32xf32>
    %102 = arith.addf %82, %101 : vector<8x32xf32>
    %c0_50 = arith.constant 0 : index
    %c0_51 = arith.constant 0 : index
    %103 = vector.load %arg10[%c0_50, %c0_51] : memref<1x32xf32, #tpu.memory_space<vmem>>, vector<1x32xf32>
    %104 = vector.broadcast %103 : vector<1x32xf32> to vector<8x32xf32>
    %105 = arith.addf %102, %104 : vector<8x32xf32>
    %c0_52 = arith.constant 0 : index
    %c0_53 = arith.constant 0 : index
    %c0_54 = arith.constant 0 : index
    %106 = vector.load %arg11[%c0_52, %c0_53, %c0_54] : memref<1x8x32xf32, #tpu.memory_space<vmem>>, vector<1x8x32xf32>
    %107 = vector.shape_cast %106 : vector<1x8x32xf32> to vector<8x32xf32>
    %108 = vector.shape_cast %105 : vector<8x32xf32> to vector<1x8x32xf32>
    tpu.vector_store %arg11[%c0_52, %c0_53, %c0_54], %108 {strides = array<i32>} : memref<1x8x32xf32, #tpu.memory_space<vmem>>, vector<1x8x32xf32>,
    return
  }
  func.func @transform_0(%arg0: i32) -> (i32, i32, i32) {
    %c0_i32 = arith.constant 0 : i32
    %c0_i32_0 = arith.constant 0 : i32
    %c0_i32_1 = arith.constant 0 : i32
    return %arg0, %c0_i32, %c0_i32_0 : i32, i32, i32
  }
  func.func @transform_1(%arg0: i32) -> (i32, i32, i32) {
    %c0_i32 = arith.constant 0 : i32
    %c0_i32_0 = arith.constant 0 : i32
    %c0_i32_1 = arith.constant 0 : i32
    return %arg0, %c0_i32, %c0_i32_0 : i32, i32, i32
  }
  func.func @transform_2(%arg0: i32) -> (i32, i32) {
    %c0_i32 = arith.constant 0 : i32
    %c0_i32_0 = arith.constant 0 : i32
    %c0_i32_1 = arith.constant 0 : i32
    return %c0_i32, %c0_i32_0 : i32, i32
  }
  func.func @transform_3(%arg0: i32) -> (i32, i32) {
    %c0_i32 = arith.constant 0 : i32
    %c0_i32_0 = arith.constant 0 : i32
    %c0_i32_1 = arith.constant 0 : i32
    return %c0_i32, %c0_i32_0 : i32, i32
  }
  func.func @transform_4(%arg0: i32) -> (i32, i32) {
    %c0_i32 = arith.constant 0 : i32
    %c0_i32_0 = arith.constant 0 : i32
    %c0_i32_1 = arith.constant 0 : i32
    return %c0_i32, %c0_i32_0 : i32, i32
  }
  func.func @transform_5(%arg0: i32) -> (i32, i32) {
    %c0_i32 = arith.constant 0 : i32
    %c0_i32_0 = arith.constant 0 : i32
    %c0_i32_1 = arith.constant 0 : i32
    return %c0_i32, %c0_i32_0 : i32, i32
  }
  func.func @transform_6(%arg0: i32) -> (i32, i32) {
    %c0_i32 = arith.constant 0 : i32
    %c0_i32_0 = arith.constant 0 : i32
    %c0_i32_1 = arith.constant 0 : i32
    return %c0_i32, %c0_i32_0 : i32, i32
  }
  func.func @transform_7(%arg0: i32) -> (i32, i32) {
    %c0_i32 = arith.constant 0 : i32
    %c0_i32_0 = arith.constant 0 : i32
    %c0_i32_1 = arith.constant 0 : i32
    return %c0_i32, %c0_i32_0 : i32, i32
  }
  func.func @transform_8(%arg0: i32) -> (i32, i32, i32) {
    %c0_i32 = arith.constant 0 : i32
    %c0_i32_0 = arith.constant 0 : i32
    %c0_i32_1 = arith.constant 0 : i32
    %c0_i32_2 = arith.constant 0 : i32
    return %c0_i32, %c0_i32_0, %c0_i32_1 : i32, i32, i32
  }
  func.func @transform_9(%arg0: i32) -> (i32, i32) {
    %c0_i32 = arith.constant 0 : i32
    %c0_i32_0 = arith.constant 0 : i32
    %c0_i32_1 = arith.constant 0 : i32
    return %c0_i32, %c0_i32_0 : i32, i32
  }
  func.func @transform_10(%arg0: i32) -> (i32, i32, i32) {
    %c0_i32 = arith.constant 0 : i32
    %c0_i32_0 = arith.constant 0 : i32
    %c0_i32_1 = arith.constant 0 : i32
    return %arg0, %c0_i32, %c0_i32_0 : i32, i32, i32
  }
}

</mosaic_0001>

<bundles_post_ra>
// kernel: tpu_custom_call.1
= control target key start
LH: loop header
LB: loop body
LE: loop exit
PB: predicated region body
PF: predicated region fallthrough
CT: control target
= control target key end

     0   :  { %s2924_s0 = inlined_call_operand.hbm [shape: f32[2,8,32], index: 0, kind: input, shape index: {}]   ;;  %s2925_s1 = inlined_call_operand.hbm [shape: bf16[2,8,8], index: 1, kind: input, shape index: {}]   ;;  %s2926_s2 = inlined_call_operand.hbm [shape: f32[32,32], index: 2, kind: input, shape index: {}]   ;;  %s2927_s3 = inlined_call_operand.vmem [shape: f32[1,32], index: 3, kind: input, shape index: {}]   ;;  %s2928_s4 = inlined_call_operand.hbm [shape: f32[32,32], index: 4, kind: input, shape index: {}]   ;;  %s2929_s5 = inlined_call_operand.vmem [shape: f32[1,32], index: 5, kind: input, shape index: {}]   ;;  %s2930_s6 = inlined_call_operand.hbm [shape: f32[32,32], index: 6, kind: input, shape index: {}]   ;;  %s2931_s7 = inlined_call_operand.vmem [shape: f32[1,32], index: 7, kind: input, shape index: {}]   ;;  %s2932_s8 = inlined_call_operand.hbm [shape: f32[4,8,32], index: 8, kind: input, shape index: {}]   ;;  %s2933_s9 = inlined_call_operand.vmem [shape: f32[1,32], index: 9, kind: input, shape index: {}]   ;;  %s2934_s10 = inlined_call_operand.hbm [shape: f32[2,8,32], index: 10, kind: output, shape index: {}]  }
   0x1   :  { %2940 = sst [smem:[#allocation20_spill]] %s2924_s0 }
   0x2   :  { %2941 = sst [smem:[#allocation21_spill]] %s2926_s2 }
   0x3   :  { %2942 = sst [smem:[#allocation22_spill]] %s2928_s4 }
   0x4   :  { %2943 = sst [smem:[#allocation23_spill]] %s2930_s6 }
   0x5   :  { %2944 = sst [smem:[#allocation24_spill]] %s2933_s9 }
   0x6   :  { %2945 = sst [smem:[#allocation25_spill]] %s2934_s10 }
   0x7   :  { %15 = vsyncpa [#allocation3], 0 }
   0x8   :  { %17 = vsyncpa [#allocation3 + $0x1], 0 }
   0x9   :  { %18 = vsyncpa [#allocation6], 0 }
   0xa   :  { %20 = vsyncpa [#allocation6 + $0x1], 0 }
   0xb   :  { %21 = vsyncpa [#allocation9], 0 }
   0xc   :  { %22 = vsyncpa [#allocation12], 0 }
   0xd   :  { %23 = vsyncpa [#allocation4], 0 }
   0xe   :  { %25 = vsyncpa [#allocation4 + $0x1], 0  ;;  %s2471_s13 = smov 0   ;;  %s2473_s14 = smov 0  }
   0xf   :  { %s2475_s15 = smov 0   ;;  %s2477_s16 = smov 0  }
  0x10 LB: > { %s2401_s17 = smov [#allocation7]   ;;  %s2492_s19 = sadd.s32 4294967295, %s2399_s16   ;;  %s2399_s16 = sphi %s2477_s16, %s2976_s16   ;;  %s2395_s15 = sphi %s2475_s15, %s2975_s15   ;;  %s2391_s14 = sphi %s2473_s14, %s2974_s14   ;;  %s2387_s13 = sphi %s2471_s13, %s2973_s13  }
  0x11   : > { %s294_s18 = sshll.u32 %s2401_s17, 4  ;;  %p1834_p0 = scmp.ge.s32.totalorder %s2399_s16, 1  ;;  %s2497_s18 = int_to_ptr.vmem [resolvable:$true] %s294_s18 }
  0x12   : > { %p2936_p1 = scmp.eq.s32.totalorder %s2492_s19, 0  ;;  %p282_p2 = scmp.lt.s32.totalorder %s2399_s16, 3 }
  0x13   : > { %s2402_s21 = smov [#allocation8]   ;;  %s2403_s24 = smov [#allocation10]  }
  0x14   : > { %p2499_p3 = pnand %p1834_p0, %p282_p2  ;;  %s310_s22 = sshll.u32 %s2402_s21, 4  ;;  %s2512_s22 = int_to_ptr.vmem [resolvable:$true] %s310_s22 }
  0x15   : > { %s326_s25 = sshll.u32 %s2403_s24, 4  ;;  %s2948_s2 = sld [smem:[#allocation21_spill]]  ;;  %s2514_s25 = int_to_ptr.vmem [resolvable:$true] %s326_s25 }
  0x16   : > { %s2946_s20 = scalar_select %p2499_p3, 1, 0 }
  0x17   : > { %p2051_p5 = pneg %p2499_p3 }
  0x19   : > { %p2508_p6 = pnand %p2051_p5, %p2936_p1 }
  0x1b   : > { %s2145_s28 = scalar_lea.hbm %s2948_s2, 512  ;;  %p2524_p8 = pneg %p2508_p6 }
  0x1c   : > { %p2146_p7 = scmp.ne.s32.totalorder %s2948_s2, %s2145_s28  ;;  %p2152_p11 = scmp.lt.u32.totalorder %s2145_s28, %s2948_s2 }
  0x1e   : > { %p2148_p9 = pnand %p2524_p8, %p2146_p7 }
  0x20   : > { %p2149_p10 = pneg %p2148_p9 }
  0x22   : > { %p2154_p12 = pnand %p2152_p11, %p2149_p10 }
  0x24   : > { %2157 = shalt.err (!%p2154_p12)
}
  0x25   : > { %s2158_s21 = scalar_lea.vmem %s2497_s18, 512  ;;  %p2166_p5 = scmp.lt.s32.totalorder %s2497_s18, %s2497_s18 }
  0x26   : > { %p2159_p13 = scmp.ne.s32.totalorder %s2497_s18, %s2158_s21  ;;  %p2167_p4 = scmp.lt.s32.totalorder %s2158_s21, %s2158_s21 }
  0x28   : > { %p2161_p0 = pnand %p2159_p13, %p2524_p8  ;;  %p2168_p7 = por %p2167_p4, %p2166_p5 }
  0x2a   : > { %p2162_p2 = pneg %p2161_p0 }
  0x2c   : > { %p2169_p9 = pnand %p2168_p7, %p2162_p2 }
  0x2e   : > { %2172 = shalt.err (!%p2169_p9)
}
  0x2f   : > { %s2404_s24 = smov 128   ;;  %s2405_s26 = smov 8  }
  0x30   : > { %2054 = dma.hbm_to_vmem [thread:$0]  (!%p2508_p6), %s2948_s2, 512, %s2497_s18, [#allocation6], %s2404_s24, %s2404_s24, %s2405_s26  }
  0x31   : > { %s2950_s4 = sld [smem:[#allocation22_spill]] }
  0x37   : > { %s2173_s12 = scalar_lea.hbm %s2950_s4, 512 }
  0x38   : > { %p2174_p4 = scmp.ne.s32.totalorder %s2950_s4, %s2173_s12  ;;  %p2180_p12 = scmp.lt.u32.totalorder %s2173_s12, %s2950_s4 }
  0x3a   : > { %p2176_p10 = pnand %p2174_p4, %p2524_p8 }
  0x3c   : > { %p2177_p11 = pneg %p2176_p10 }
  0x3e   : > { %p2182_p13 = pnand %p2180_p12, %p2177_p11 }
  0x40   : > { %2185 = shalt.err (!%p2182_p13)
}
  0x41   : > { %s2186_s18 = scalar_lea.vmem %s2512_s22, 512  ;;  %p2194_p7 = scmp.lt.s32.totalorder %s2512_s22, %s2512_s22 }
  0x42   : > { %p2187_p0 = scmp.ne.s32.totalorder %s2512_s22, %s2186_s18  ;;  %p2195_p9 = scmp.lt.s32.totalorder %s2186_s18, %s2186_s18 }
  0x44   : > { %p2189_p2 = pnand %p2187_p0, %p2524_p8  ;;  %p2196_p4 = por %p2195_p9, %p2194_p7 }
  0x46   : > { %p2190_p5 = pneg %p2189_p2 }
  0x48   : > { %p2197_p10 = pnand %p2196_p4, %p2190_p5 }
  0x4a   : > { %2200 = shalt.err (!%p2197_p10)
}
  0x4b   : > { %2057 = dma.hbm_to_vmem [thread:$0]  (!%p2508_p6), %s2950_s4, 512, %s2512_s22, [#allocation9], %s2404_s24, %s2404_s24, %s2405_s26  }
  0x4c   : > { %s2951_s6 = sld [smem:[#allocation23_spill]] }
  0x52   : > { %s2201_s29 = scalar_lea.hbm %s2951_s6, 512 }
  0x53   : > { %p2202_p11 = scmp.ne.s32.totalorder %s2951_s6, %s2201_s29  ;;  %p2208_p0 = scmp.lt.u32.totalorder %s2201_s29, %s2951_s6 }
  0x55   : > { %p2204_p12 = pnand %p2202_p11, %p2524_p8 }
  0x57   : > { %p2205_p13 = pneg %p2204_p12 }
  0x59   : > { %p2210_p2 = pnand %p2208_p0, %p2205_p13 }
  0x5b   : > { %2213 = shalt.err (!%p2210_p2)
}
  0x5c   : > { %s2214_s22 = scalar_lea.vmem %s2514_s25, 512  ;;  %p2222_p4 = scmp.lt.s32.totalorder %s2514_s25, %s2514_s25 }
  0x5d   : > { %p2215_p5 = scmp.ne.s32.totalorder %s2514_s25, %s2214_s22  ;;  %p2223_p10 = scmp.lt.s32.totalorder %s2214_s22, %s2214_s22 }
  0x5f   : > { %p2217_p7 = pnand %p2215_p5, %p2524_p8  ;;  %p2224_p11 = por %p2223_p10, %p2222_p4 }
  0x61   : > { %p2218_p9 = pneg %p2217_p7 }
  0x63   : > { %p2225_p12 = pnand %p2224_p11, %p2218_p9 }
  0x65   : > { %2228 = shalt.err (!%p2225_p12)
}
  0x66   : > { %2060 = dma.hbm_to_vmem [thread:$0]  (!%p2508_p6), %s2951_s6, 512, %s2514_s25, [#allocation9], %s2404_s24, %s2404_s24, %s2405_s26  }
  0x67   : > { %s2406_s10 = smov [#allocation11]   ;;  %s2229_s30 = scalar_lea.hbm %s2932_s8, 512 }
  0x68   : > { %s342_s27 = sshll.u32 %s2406_s10, 4  ;;  %p2230_p13 = scmp.ne.s32.totalorder %s2932_s8, %s2229_s30  ;;  %s343_s27 = int_to_ptr.vmem [resolvable:$true] %s342_s27 }
  0x69   : > { %p2236_p5 = scmp.lt.u32.totalorder %s2229_s30, %s2932_s8 }
  0x6a   : > { %p2232_p0 = pnand %p2230_p13, %p2524_p8 }
  0x6c   : > { %p2233_p2 = pneg %p2232_p0 }
  0x6e   : > { %p2238_p7 = pnand %p2236_p5, %p2233_p2 }
  0x70   : > { %2241 = shalt.err (!%p2238_p7)
}
  0x71   : > { %s2242_s25 = scalar_lea.vmem %s343_s27, 512  ;;  %p2250_p11 = scmp.lt.s32.totalorder %s343_s27, %s343_s27 }
  0x72   : > { %p2243_p9 = scmp.ne.s32.totalorder %s343_s27, %s2242_s25  ;;  %p2251_p12 = scmp.lt.s32.totalorder %s2242_s25, %s2242_s25 }
  0x74   : > { %p2245_p4 = pnand %p2243_p9, %p2524_p8  ;;  %p2252_p1 = por %p2251_p12, %p2250_p11 }
  0x76   : > { %p2246_p10 = pneg %p2245_p4 }
  0x78   : > { %p2253_p3 = pnand %p2252_p1, %p2246_p10 }
  0x7a   : > { %2256 = shalt.err (!%p2253_p3)
}
  0x7b   : > { %2063 = dma.hbm_to_vmem [thread:$0]  (!%p2508_p6), %s2932_s8, 512, %s343_s27, [#allocation12], %s2404_s24, %s2404_s24, %s2405_s26  }
  0x7c   : > { %s1833_s23 = sadd.s32 4294967294, %s2399_s16   ;;  %s2623_s11 = sadd.s32 1, %s2399_s16  }
  0x7d   : > { %s35_s10 = ssub.s32 %s2399_s16, %s2623_s11  ;;  %s38_s28 = sadd.s32 1, %s2395_s15 }
  0x7e   : > { %p36_p1 = scmp.eq.s32.totalorder %s35_s10, 0  ;;  %p45_p3 = scmp.ne.s32.totalorder %s2395_s15, %s2391_s14 }
  0x7f   : > { %p46_p8 = scmp.eq.s32.totalorder %s2399_s16, 0  ;;  %p51_p13 = scmp.ne.s32.totalorder %s2391_s14, %s2387_s13 }
  0x80   : > { %s2634_s29 = scalar_select %p36_p1, %s2395_s15, %s38_s28  }
  0x81   : > { %p2636_p0 = por %p46_p8, %p45_p3  ;;  %p2953_p2 = scmp.eq.s32.totalorder %s2492_s19, 0 }
  0x82   : > { %p269_p5 = scmp.eq.s32.totalorder %s2492_s19, 1  ;;  %p275_p7 = scmp.eq.s32.totalorder %s1833_s23, 1 }
  0x83   : > { %p2642_p6 = por %p2953_p2, %p51_p13  ;;  %p2079_p9 = scmp.lt.s32.totalorder %s2399_s16, 2 }
  0x84   : > { %s2649_s26 = sand.u32 1, %s2395_s15   ;;  %p2651_p4 = por %p269_p5, %p45_p3 }
  0x85   : > { %s2954_s24 = scalar_select %p2642_p6, 1, 0 }
  0x86   : > { %s2955_s27 = scalar_select %p2651_p4, 1, 0 }
  0x87   : > { %p2655_p10 = por %p275_p7, %p51_p13  ;;  %s1840_s17 = sshll.u32 %s2649_s26, 3 }
  0x88   : > { %s1841_s21 = sshll.u32 %s2399_s16, 7  ;;  %s2957_s0 = sld [smem:[#allocation20_spill]] }
  0x89   : > { %s2956_s12 = scalar_select %p2655_p10, 1, 0 }
  0x8a   : > { %s363_s9 = scalar_lea.vmem [#allocation2], %s1840_s17  ;;  %p2670_p11 = pnand %p2079_p9, %p2636_p0 }
  0x8b   : > { %s370_s23 = sshll.u32 %s363_s9, 4  ;;  %s1842_s2 = sshll.u32 %s2649_s26, 2  ;;  %s2666_s23 = int_to_ptr.vmem [resolvable:$true] %s370_s23 }
  0x8c   : > { %s360_s22 = scalar_lea.sflag [#allocation3], %s2649_s26  ;;  %p2259_p1 = pneg %p2670_p11 }
  0x8e   : > { %s2664_s18 = scalar_lea.hbm %s2957_s0, %s1841_s21  ;;  %s2262_s30 = scalar_lea.hbm %s2957_s0, 256 }
  0x8f   : > { %s2257_s21 = scalar_lea.hbm %s2664_s18, 128  ;;  %p2263_p13 = scmp.lt.u32.totalorder %s2664_s18, %s2957_s0 }
  0x90   : > { %p2258_p12 = scmp.ne.s32.totalorder %s2664_s18, %s2257_s21  ;;  %p2264_p0 = scmp.lt.u32.totalorder %s2262_s30, %s2257_s21 }
  0x91   : > { %p2266_p5 = scmp.lt.u32.totalorder %s2257_s21, %s2664_s18 }
  0x92   : > { %p2260_p3 = pnand %p2259_p1, %p2258_p12  ;;  %p2265_p2 = por %p2264_p0, %p2263_p13 }
  0x94   : > { %p2261_p8 = pneg %p2260_p3  ;;  %p2267_p7 = por %p2266_p5, %p2265_p2 }
  0x96   : > { %p2268_p9 = pnand %p2267_p7, %p2261_p8 }
  0x98   : > { %2271 = shalt.err (!%p2268_p9)
}
  0x99   : > { %s2272_s28 = scalar_lea.vmem %s2666_s23, 128  ;;  %s2407_s17 = smov [#allocation2]  }
  0x9a   : > { %p2273_p12 = scmp.ne.s32.totalorder %s2666_s23, %s2272_s28  ;;  %s2277_s25 = sshll.u32 %s2407_s17, 4  ;;  %s2278_s25 = int_to_ptr.vmem [resolvable:$false] %s2277_s25 }
  0x9b   : > { %s2279_s4 = scalar_lea.vmem %s2278_s25, 256  ;;  %p2280_p4 = scmp.lt.s32.totalorder %s2666_s23, %s2278_s25 }
  0x9c   : > { %p2275_p3 = pnand %p2273_p12, %p2259_p1  ;;  %p2281_p13 = scmp.lt.s32.totalorder %s2279_s4, %s2272_s28 }
  0x9e   : > { %p2276_p10 = pneg %p2275_p3  ;;  %p2282_p0 = por %p2281_p13, %p2280_p4 }
  0xa0   : > { %p2283_p2 = pnand %p2282_p0, %p2276_p10 }
  0xa2   : > { %2286 = shalt.err (!%p2283_p2)
}
  0xa3   : > { %2067 = dma.hbm_to_vmem [thread:$0]  (!%p2670_p11), %s2664_s18, 128, %s2666_s23, %s360_s22  }
  0xa4   : > { %s1843_s21 = sshll.u32 %s2399_s16, 6  ;;  %s381_s28 = scalar_lea.vmem [#allocation5], %s1842_s2 }
  0xa5   : > { %s2706_s17 = scalar_lea.hbm %s2925_s1, %s1843_s21  ;;  %s388_s25 = sshll.u32 %s381_s28, 4  ;;  %s389_s25 = int_to_ptr.vmem [resolvable:$true] %s388_s25 }
  0xa6   : > { %s2959_s4 = sand.u32 1, %s2399_s16   ;;  %s2287_s6 = scalar_lea.hbm %s2706_s17, 64 }
  0xa7   : > { %s378_s0 = scalar_lea.sflag [#allocation6], %s2959_s4  ;;  %p2288_p4 = scmp.ne.s32.totalorder %s2706_s17, %s2287_s6 }
  0xa8   : > { %s2292_s22 = scalar_lea.hbm %s2925_s1, 128  ;;  %p2293_p5 = scmp.lt.u32.totalorder %s2706_s17, %s2925_s1 }
  0xa9   : > { %p2290_p10 = pnand %p2288_p4, %p2259_p1  ;;  %p2294_p7 = scmp.lt.u32.totalorder %s2292_s22, %s2287_s6 }
  0xaa   : > { %p2296_p12 = scmp.lt.u32.totalorder %s2287_s6, %s2706_s17 }
  0xab   : > { %p2291_p8 = pneg %p2290_p10  ;;  %p2295_p9 = por %p2294_p7, %p2293_p5 }
  0xad   : > { %p2297_p3 = por %p2296_p12, %p2295_p9 }
  0xaf   : > { %p2298_p13 = pnand %p2297_p3, %p2291_p8 }
  0xb1   : > { %2301 = shalt.err (!%p2298_p13)
}
  0xb2   : > { %s2302_s2 = scalar_lea.vmem %s389_s25, 64  ;;  %s2408_s30 = smov [#allocation5]  }
  0xb3   : > { %p2303_p0 = scmp.ne.s32.totalorder %s389_s25, %s2302_s2  ;;  %s2307_s9 = sshll.u32 %s2408_s30, 4  ;;  %s2308_s9 = int_to_ptr.vmem [resolvable:$false] %s2307_s9 }
  0xb4   : > { %s2309_s28 = scalar_lea.vmem %s2308_s9, 128  ;;  %p2310_p10 = scmp.lt.s32.totalorder %s389_s25, %s2308_s9 }
  0xb5   : > { %p2305_p2 = pnand %p2303_p0, %p2259_p1  ;;  %p2311_p6 = scmp.lt.s32.totalorder %s2309_s28, %s2302_s2 }
  0xb7   : > { %p2306_p4 = pneg %p2305_p2  ;;  %p2312_p5 = por %p2311_p6, %p2310_p10 }
  0xb9   : > { %p2313_p7 = pnand %p2312_p5, %p2306_p4 }
  0xbb   : > { %2316 = shalt.err (!%p2313_p7)
}
  0xbc   : > { %2070 = dma.hbm_to_vmem [thread:$0]  (!%p2670_p11), %s2706_s17, 64, %s389_s25, %s378_s0  }
  0xbd   : > { %p2960_p8 = scmp.ne.s32.totalorder %s2946_s20, 0 }
  0xbe   : > { %s2734_s6 = sand.u32 (!%p2960_p8), 1, %s2391_s14   ;;  %p2961_p6 = scmp.ne.s32.totalorder (!%p2960_p8), %s2954_s24, 0 }
  0xbf   : > { %397 = sbr.rel (%p2960_p8) target bundleno = 2339 (0x923), region = 60  ;;  %s1845_s4 = sshll.u32 (!%p2960_p8), %s2734_s6, 3 }
  0xc0   : > { %s400_s18 = scalar_lea.sflag (!%p2960_p8), [#allocation3], %s2734_s6  ;;  %s2740_s23 = scalar_lea.vmem (!%p2960_p8), [#allocation2], %s1845_s4 }
  0xc6   : > { %2362 = dma.done.wait (%p2961_p6), %s400_s18, 128  }
  0xc7   : > { %2364 = vsyncadd (%p2961_p6), %s400_s18, 4294967168  ;;  %s408_s0 = sand.u32 1, %s2492_s19   ;;  %s1846_s20 = sshll.u32 %s2734_s6, 2 }
  0xc8   : > { %s409_s10 = scalar_lea.sflag [#allocation6], %s408_s0  ;;  %s2748_s17 = scalar_lea.vmem [#allocation5], %s1846_s20 }
  0xc9   : > { %2366 = dma.done.wait (%p2961_p6), %s409_s10, 64  }
  0xca   : > { %2368 = vsyncadd (%p2961_p6), %s409_s10, 4294967232  ;;  %p2962_p11 = scmp.eq.s32.totalorder %s2492_s19, 0 }
  0xcc   : > { %2370 = dma.done.wait (%p2962_p11), [#allocation6], 512   ;;  %p2963_p1 = pmov %p2962_p11 }
  0xce   : > { %2372 = vsyncadd (%p2963_p1), [#allocation6], 4294966784  ;;  %p2964_p9 = pmov %p2963_p1 }
  0xcf   : > { %p2965_p12 = pmov %p2963_p1 }
  0xd0   : > { %2374 = dma.done.wait (%p2964_p9), [#allocation9], 1024  }
  0xd1   : > { %2376 = vsyncadd (%p2965_p12), [#allocation9], 4294966272  ;;  %p2966_p3 = pmov %p2963_p1 }
  0xd2   : > { %p2967_p13 = pmov %p2963_p1 }
  0xd3   : > { %2378 = dma.done.wait (%p2966_p3), [#allocation12], 512  }
  0xd4   : > { %2380 = vsyncadd (%p2967_p13), [#allocation12], 4294966784  ;;  %v2409_v0 = vmov 0.0|0.0   ;;  %vm2410_vm0 = vmmov 0   ;;  %v2411_v1 = vmov 0.0   ;;  %v473_v2 = vld [vmem:[#allocation7] sm:$0xff] }
  0xd5   : > { %2011 = vmatprep.subr.bf16.mxu0 %v2409_v0  ;;  %2017 = vmatprep.subr.bf16.mxu1 %v2409_v0  ;;  %v474_v3 = vld [vmem:[#allocation7 + $0x8] sm:$0xff]  ;;  %v558_v4 = vld [vmem:[#allocation8] sm:$0xff]  ;;  %v475_v7 = vld [vmem:[#allocation7 + $0x10] sm:$0xff]  ;;  %vm484_vm1 = vcmask 261120   ;;  %vm721_vm2 = vcmask 64512   ;;  %s2412_s21 = smov 120  }
  0xd6   : > { %1937 = vmatprep.mubr.msk.f32.mxu1 %vm2410_vm0, %v2411_v1  ;;  %1926 = vmatprep.mubr.msk.f32.mxu0 %vm2410_vm0, %v2411_v1  ;;  %v2012_v5 = vpack.c.bf16 %v474_v3, %v473_v2  ;;  %v559_v6 = vld [vmem:[#allocation8 + $0x8] sm:$0xff]  ;;  %v476_v8 = vld [vmem:[#allocation7 + $0x18] sm:$0xff]  ;;  %v560_v10 = vld [vmem:[#allocation8 + $0x10] sm:$0xff]  ;;  %s2413_s9 = smov 112   ;;  %s2414_s28 = smov 104  }
  0xd7   : > { %v2018_v9 = vpack.c.bf16 %v559_v6, %v558_v4  ;;  %v561_v11 = vld [vmem:[#allocation8 + $0x18] sm:$0xff]  ;;  %v2015_v12 = vpack.c.bf16 %v476_v8, %v475_v7  ;;  %v639_v14 = vld [vmem:[#allocation10] sm:$0xff]  ;;  %v640_v15 = vld [vmem:[#allocation10 + $0x8] sm:$0xff]  ;;  %s2968_s0 = sld [smem:[#allocation24_spill]]  ;;  %s1876_s20 = sshll.u32 %s2492_s19, 7 }
  0xd8   : > { %2013 = vmatpush3.bf16.msra.mxu0 %v2012_v5  ;;  %v2021_v13 = vpack.c.bf16 %v561_v11, %v560_v10  ;;  %v470_v16 = vld [vmem:[%s2740_s23] sm:$0xff]  ;;  %v2024_v17 = vpack.c.bf16 %v640_v15, %v639_v14  ;;  %v642_v19 = vld [vmem:[#allocation10 + $0x18] sm:$0xff]  ;;  %v882_v55 = vld [vmem:[#allocation11] sm:$0xff]  ;;  %s469_s10 = scalar_lea.vmem [#allocation13], %s1845_s4  ;;  %s2969_s22 = sld [smem:[#allocation25_spill]] }
  0xd9   : > { %2019 = vmatpush3.bf16.msra.mxu1 %v2018_v9  ;;  %2014 = vmatprep.subr.bf16.mxu0 %v2409_v0  ;;  %v641_v18 = vld [vmem:[#allocation10 + $0x10] sm:$0xff]  ;;  %v1852_v21 = vld [vmem:[%s2927_s3] ss:$0 sm:$0xff]  ;;  %v471_v36 = vld [vmem:[%s2748_s17] sm:$0xf]  ;;  %s1702_s17 = sshll.u32 %s469_s10, 4  ;;  %s2881_s17 = int_to_ptr.vmem [resolvable:$true] %s1702_s17 }
  0xda   : > { %2020 = vmatprep.subr.bf16.mxu1 %v2409_v0  ;;  %v2027_v20 = vpack.c.bf16 %v642_v19, %v641_v18  ;;  %v1854_v22 = vld [vmem:[%s2929_s5] ss:$0 sm:$0xff]  ;;  %v2813_v37 = vunpack.c.l.bf16 %v471_v36  ;;  %s2317_s19 = scalar_lea.vmem %s2881_s17, 128  ;;  %p2970_p2 = scmp.ne.s32.totalorder %s2955_s27, 0 }
  0xdb   : > { %v1856_v30 = vld [vmem:[%s2931_s7] ss:$0 sm:$0xff]  ;;  %p2318_p0 = scmp.ne.s32.totalorder %s2881_s17, %s2317_s19  ;;  %s2415_s4 = smov [#allocation13]  }
  0xdc   : > { %2016 = vmatpush3.bf16.msra.mxu0 %v2015_v12  ;;  %v1050_v58 = vld [vmem:[#allocation11 + $0x8] sm:$0xff]  ;;  %s2321_s2 = sshll.u32 %s2415_s4, 4  ;;  %s2322_s2 = int_to_ptr.vmem [resolvable:$false] %s2321_s2 }
  0xdd   : > { %2022 = vmatpush3.bf16.msra.mxu1 %v2021_v13  ;;  %2023 = vmatprep.subr.bf16.mxu0 %v2409_v0  ;;  %p2319_p4 = pnand %p2318_p0, %p2970_p2  ;;  %s2323_s30 = scalar_lea.vmem %s2322_s2, 256 }
  0xde   : > { %1951 = vmatprep.subr.mxu1 %v2411_v1  ;;  %s2879_s26 = scalar_lea.hbm %s2969_s22, %s1876_s20  ;;  %p2324_p5 = scmp.lt.s32.totalorder %s2881_s17, %s2322_s2 }
  0xdf   : > { %1927 = vmatmul.mubr.msk.f32.vlgmr.msra.gmra.mrb[0].mxu0 %vm484_vm1, %v470_v16  ;;  %p2320_p10 = pneg %p2319_p4  ;;  %p2325_p7 = scmp.lt.s32.totalorder %s2323_s30, %s2317_s19 }
  0xe0   : > { %1938 = vmatmul.mubr.msk.f32.vlgmr.msra.gmra.mrb[0].mxu1 %vm484_vm1, %v470_v16  ;;  %2025 = vmatpush3.bf16.msra.mxu0 %v2024_v17 }
  0xe1   : > { %2026 = vmatprep.subr.bf16.mxu0 %v2409_v0  ;;  %1948 = vmatprep.mubr.msk.f32.mxu0 %vm2410_vm0, %v2411_v1  ;;  %p2326_p8 = por %p2325_p7, %p2324_p5 }
  0xe2   : > { %1953 = vmatprep.mubr.msk.f32.mxu1 %vm2410_vm0, %v2411_v1 }
  0xe3   : > { %p2327_p6 = pnand %p2326_p8, %p2320_p10 }
  0xe4   : > { %2028 = vmatpush3.bf16.msra.mxu0 %v2027_v20 }
  0xe5   : > { %1961 = vmatprep.subr.mxu0 %v2411_v1 }
  0xe7   : > { %1949 = vmatmul.mubr.msk.f32.vlgmr.msra.gmra.mrb[2].mxu0 %vm484_vm1, %v470_v16 }
  0xe8   : > { %1963 = vmatprep.mubr.msk.f32.mxu0 %vm2410_vm0, %v2411_v1 }
 0x1b2   : > { %v554_v23 = vpop.f32.mrb[0].mxu0 }
 0x1b3   : > { %v635_v24 = vpop.f32.mrb[0].mxu1  ;;  %v555_v25 = vadd.f32 %v1852_v21, %v554_v23  ;;  %v1928_v26 = vpop.f32.mrb[1].mxu0 }
 0x1b4   : > { %v2788_v27 = vadd.f32 %v1854_v22, %v635_v24  ;;  %v1939_v28 = vpop.f32.mrb[1].mxu1 }
 0x1b5   : > { %v720_v29 = vmul.f32 0.35355338, %v555_v25  ;;  %v1363_v25 = vld [vmem:[#allocation11 + $0x10] sm:$0xff] }
 0x1b6   : > { %885 = vrot.lane.b32.xlu0 %v2788_v27, %s2412_s21  ;;  %1952 = vmatpush3.xpose.msk.msra.mxu1 %vm721_vm2, %v2788_v27 }
 0x1b7   : > { %1956 = vmatprep.subr.mxu1 %v2411_v1 }
 0x1b9   : > { %1954 = vmatmul.mubr.msk.f32.vlgmr.msra.gmra.mrb[2].mxu1 %vm721_vm2, %v720_v29 }
 0x1ba   : > { %883 = vrot.lane.b32.xlu0 %v720_v29, %s2412_s21  ;;  %v716_v31 = vpop.f32.mrb[2].mxu0  ;;  %1958 = vmatprep.mubr.msk.f32.mxu1 %vm2410_vm0, %v2411_v1 }
 0x1bb   : > { %v2800_v32 = vadd.f32 %v1856_v30, %v716_v31  ;;  %v1950_v33 = vpop.f32.mrb[3].mxu0 }
 0x1bd   : > { %1957 = vmatpush3.msra.mxu1 %v2800_v32 }
 0x1be   : > { %972 = vrot.lane.b32.xlu0 %v2800_v32, %s2412_s21  ;;  %1966 = vmatprep.subr.mxu1 %v2411_v1  ;;  %s1689_s21 = scalar_lea.sflag [#allocation4], %s2734_s6 }
 0x1c2   : > { %1199 = vrot.lane.b32.xlu0 %v2788_v27, %s2413_s9 }
 0x228   : > { %v886_v34 = vpop.permute.xlu0 %885 }
 0x229   : > { %1962 = vmatpush3.xpose.msk.msra.mxu0 %vm721_vm2, %v886_v34 }
 0x22a   : > { %1971 = vmatprep.subr.mxu0 %v2411_v1 }
 0x22c   : > { %v884_v35 = vpop.permute.xlu0 %883 }
 0x22d   : > { %1964 = vmatmul.mubr.msk.f32.vlgmr.msra.gmra.mrb[4].mxu0 %vm721_vm2, %v884_v35 }
 0x22e   : > { %1973 = vmatprep.mubr.msk.f32.mxu0 %vm2410_vm0, %v2411_v1  ;;  %1972 = vmatpush3.msra.mxu0 %v1050_v58 }
 0x22f   : > { %1981 = vmatprep.subr.mxu0 %v2411_v1 }
 0x230   : > { %v973_v50 = vpop.permute.xlu0 %972 }
 0x234   : > { %v1200_v59 = vpop.permute.xlu0 %1199 }
 0x28c   : > { %v794_v38 = vpop.f32.mrb[2].mxu1 }
 0x28d   : > { %v795_v39 = vadd.f32 %v794_v38, %v2813_v37  ;;  %v1955_v40 = vpop.f32.mrb[3].mxu1 }
 0x28f   : > { %v798_v41 = vsel %vm721_vm2, %v795_v39, -inf }
 0x290   : > { %799 = vmax.xlane.f32.xlu1 %v798_v41 }
 0x300   : > { %v957_v42 = vpop.f32.mrb[4].mxu0 }
 0x301   : > { %v958_v43 = vadd.f32 %v957_v42, %v2813_v37  ;;  %v1965_v44 = vpop.f32.mrb[5].mxu0  ;;  %v1604_v42 = vld [vmem:[#allocation11 + $0x18] sm:$0xff] }
 0x303   : > { %v961_v45 = vsel %vm721_vm2, %v958_v43, -inf }
 0x304   : > { %962 = vmax.xlane.f32.xlu1 %v961_v45 }
 0x31d   : > { %v800_v46 = vpop.xlane.xlu1 %799 }
 0x31e   : > { %v801_v47 = vsub.f32 %v795_v39, %v800_v46 }
 0x320   : > { %v802_v48 = vmul.f32 1.442695, %v801_v47 }
 0x322   : > { %2129 = vpow2.f32 %v802_v48 }
 0x32c   : > { %v2130_v49 = vpop.eup %2129 }
 0x32d   : > { %1959 = vmatmul.mubr.msk.f32.vlgmr.msra.gmra.mrb[4].mxu1 %vm721_vm2, %v2130_v49  ;;  %v804_v51 = vsel %vm721_vm2, %v2130_v49, 0.0 }
 0x32e   : > { %805 = vadd.xlane.f32.xlu0 %v804_v51  ;;  %1967 = vmatpush3.msra.mxu1 %v973_v50  ;;  %v1874_v50 = vld [vmem:[%s2968_s0] ss:$0 sm:$0xff] }
 0x32f   : > { %1968 = vmatprep.mubr.msk.f32.mxu1 %vm2410_vm0, %v2411_v1  ;;  %1976 = vmatprep.subr.mxu1 %v2411_v1 }
 0x344   : > { %1285 = vrot.lane.b32.xlu0 %v2800_v32, %s2413_s9 }
 0x348   : > { %1438 = vrot.lane.b32.xlu0 %v720_v29, %s2414_s28 }
 0x391   : > { %v963_v52 = vpop.xlane.xlu1 %962 }
 0x392   : > { %v964_v53 = vsub.f32 %v958_v43, %v963_v52 }
 0x394   : > { %v965_v54 = vmul.f32 1.442695, %v964_v53 }
 0x396   : > { %2131 = vpow2.f32 %v965_v54 }
 0x3a0   : > { %v2132_v56 = vpop.eup %2131 }
 0x3a1   : > { %1969 = vmatmul.mubr.msk.f32.vlgmr.msra.gmra.mrb[6].mxu1 %vm721_vm2, %v2132_v56  ;;  %v967_v57 = vsel %vm721_vm2, %v2132_v56, 0.0 }
 0x3a2   : > { %968 = vadd.xlane.f32.xlu1 %v967_v57  ;;  %1977 = vmatpush3.msra.mxu1 %v882_v55 }
 0x3a3   : > { %1978 = vmatprep.mubr.msk.f32.mxu1 %vm2410_vm0, %v2411_v1  ;;  %1986 = vmatprep.subr.mxu1 %v2411_v1 }
 0x3b3   : > { %1197 = vrot.lane.b32.xlu1 %v720_v29, %s2413_s9 }
 0x3bb   : > { %v806_v60 = vpop.xlane.xlu0 %805 }
 0x3bc   : > { %2133 = vrcp.f32 %v806_v60 }
 0x3bf   : > { %v1286_v2 = vpop.permute.xlu0 %1285 }
 0x3c3   : > { %v1439_v24 = vpop.permute.xlu0 %1438 }
 0x3c6   : > { %v2134_v61 = vpop.eup %2133 }
 0x400   : > { %v877_v62 = vpop.f32.mrb[4].mxu1 }
 0x401   : > { %v881_v63 = vmul.f32 %v2134_v61, %v877_v62  ;;  %v1960_v0 = vpop.f32.mrb[5].mxu1 }
 0x403   : > { %1979 = vmatmul.mubr.msk.f32.vlgmr.msra.gmra.mrb[8].mxu1 %vm721_vm2, %v881_v63 }
 0x404   : > { %1987 = vmatpush3.msra.mxu1 %v1286_v2  ;;  %1988 = vmatprep.mubr.msk.f32.mxu1 %vm2410_vm0, %v2411_v1 }
 0x405   : > { %1996 = vmatprep.subr.mxu1 %v2411_v1 }
 0x42f   : > { %v969_v3 = vpop.xlane.xlu1 %968 }
 0x430   : > { %2135 = vrcp.f32 %v969_v3 }
 0x433   : > { %v1198_v8 = vpop.permute.xlu1 %1197 }
 0x43a   : > { %v2136_v4 = vpop.eup %2135 }
 0x474   : > { %v1044_v5 = vpop.f32.mrb[6].mxu1 }
 0x475   : > { %v1048_v6 = vmul.f32 %v2136_v4, %v1044_v5  ;;  %v1970_v7 = vpop.f32.mrb[7].mxu1 }
 0x477   : > { %1974 = vmatmul.mubr.msk.f32.vlgmr.msra.gmra.mrb[6].mxu0 %vm721_vm2, %v1048_v6 }
 0x478   : > { %1982 = vmatpush3.xpose.msk.msra.mxu0 %vm721_vm2, %v1200_v59  ;;  %1983 = vmatprep.mubr.msk.f32.mxu0 %vm2410_vm0, %v2411_v1 }
 0x479   : > { %1991 = vmatprep.subr.mxu0 %v2411_v1 }
 0x47b   : > { %1984 = vmatmul.mubr.msk.f32.vlgmr.msra.gmra.mrb[8].mxu0 %vm721_vm2, %v1198_v8 }
 0x47c   : > { %1993 = vmatprep.mubr.msk.f32.mxu0 %vm2410_vm0, %v2411_v1  ;;  %1992 = vmatpush3.msra.mxu0 %v1363_v25 }
 0x47d   : > { %2001 = vmatprep.subr.mxu0 %v2411_v1 }
 0x4d6   : > { %v1193_v9 = vpop.f32.mrb[8].mxu1 }
 0x4d7   : > { %v1980_v10 = vpop.f32.mrb[9].mxu1 }
 0x54a   : > { %v1120_v11 = vpop.f32.mrb[6].mxu0 }
 0x54b   : > { %v1194_v12 = vadd.f32 %v1193_v9, %v1120_v11  ;;  %v1975_v13 = vpop.f32.mrb[7].mxu0 }
 0x54e   : > { %v1271_v14 = vpop.f32.mrb[8].mxu0 }
 0x54f   : > { %v1272_v15 = vadd.f32 %v1271_v14, %v2813_v37  ;;  %v1985_v16 = vpop.f32.mrb[9].mxu0 }
 0x551   : > { %v1275_v17 = vsel %vm721_vm2, %v1272_v15, -inf }
 0x552   : > { %1276 = vmax.xlane.f32.xlu1 %v1275_v17 }
 0x563   : > { %1440 = vrot.lane.b32.xlu1 %v2788_v27, %s2414_s28 }
 0x5df   : > { %v1277_v18 = vpop.xlane.xlu1 %1276 }
 0x5e0   : > { %v1278_v19 = vsub.f32 %v1272_v15, %v1277_v18 }
 0x5e2   : > { %v1279_v20 = vmul.f32 1.442695, %v1278_v19 }
 0x5e3   : > { %v1441_v22 = vpop.permute.xlu1 %1440 }
 0x5e4   : > { %2137 = vpow2.f32 %v1279_v20 }
 0x5ee   : > { %v2138_v21 = vpop.eup %2137 }
 0x5ef   : > { %1989 = vmatmul.mubr.msk.f32.vlgmr.msra.gmra.mrb[10].mxu1 %vm721_vm2, %v2138_v21  ;;  %v1281_v23 = vsel %vm721_vm2, %v2138_v21, 0.0 }
 0x5f0   : > { %1997 = vmatpush3.xpose.msk.msra.mxu1 %vm721_vm2, %v1441_v22  ;;  %1282 = vadd.xlane.f32.xlu0 %v1281_v23 }
 0x5f1   : > { %1998 = vmatprep.mubr.msk.f32.mxu1 %vm2410_vm0, %v2411_v1  ;;  %2006 = vmatprep.subr.mxu1 %v2411_v1 }
 0x5f3   : > { %1999 = vmatmul.mubr.msk.f32.vlgmr.msra.gmra.mrb[12].mxu1 %vm721_vm2, %v1439_v24 }
 0x5f4   : > { %2008 = vmatprep.mubr.msk.f32.mxu1 %vm2410_vm0, %v2411_v1  ;;  %2007 = vmatpush3.msra.mxu1 %v1604_v42 }
 0x606   : > { %1526 = vrot.lane.b32.xlu0 %v2800_v32, %s2414_s28 }
 0x67d   : > { %v1283_v26 = vpop.xlane.xlu0 %1282 }
 0x67e   : > { %2139 = vrcp.f32 %v1283_v26 }
 0x681   : > { %v1527_v31 = vpop.permute.xlu0 %1526 }
 0x688   : > { %v2140_v27 = vpop.eup %2139 }
 0x6c2   : > { %v1357_v28 = vpop.f32.mrb[10].mxu1 }
 0x6c3   : > { %v1361_v29 = vmul.f32 %v2140_v27, %v1357_v28  ;;  %v1990_v30 = vpop.f32.mrb[11].mxu1 }
 0x6c5   : > { %1994 = vmatmul.mubr.msk.f32.vlgmr.msra.gmra.mrb[10].mxu0 %vm721_vm2, %v1361_v29 }
 0x6c6   : > { %2002 = vmatpush3.msra.mxu0 %v1527_v31  ;;  %v1512_v33 = vpop.f32.mrb[12].mxu1  ;;  %2003 = vmatprep.mubr.msk.f32.mxu0 %vm2410_vm0, %v2411_v1 }
 0x6c7   : > { %v1513_v32 = vadd.f32 %v1512_v33, %v2813_v37  ;;  %v2000_v34 = vpop.f32.mrb[13].mxu1 }
 0x6c9   : > { %v1516_v35 = vsel %vm721_vm2, %v1513_v32, -inf }
 0x6ca   : > { %1517 = vmax.xlane.f32.xlu1 %v1516_v35 }
 0x757   : > { %v1518_v36 = vpop.xlane.xlu1 %1517 }
 0x758   : > { %v1519_v38 = vsub.f32 %v1513_v32, %v1518_v36 }
 0x75a   : > { %v1520_v39 = vmul.f32 1.442695, %v1519_v38 }
 0x75c   : > { %2141 = vpow2.f32 %v1520_v39 }
 0x766   : > { %v2142_v40 = vpop.eup %2141 }
 0x767   : > { %2004 = vmatmul.mubr.msk.f32.vlgmr.msra.gmra.mrb[12].mxu0 %vm721_vm2, %v2142_v40  ;;  %v1522_v41 = vsel %vm721_vm2, %v2142_v40, 0.0 }
 0x768   : > { %1523 = vadd.xlane.f32.xlu1 %v1522_v41 }
 0x798   : > { %v1433_v1 = vpop.f32.mrb[10].mxu0 }
 0x799   : > { %v1437_v37 = vadd.f32 %v1433_v1, %v1194_v12  ;;  %v1995_v43 = vpop.f32.mrb[11].mxu0 }
 0x7f5   : > { %v1524_v44 = vpop.xlane.xlu1 %1523 }
 0x7f6   : > { %2143 = vrcp.f32 %v1524_v44 }
 0x800   : > { %v2144_v45 = vpop.eup %2143 }
 0x83a   : > { %v1598_v46 = vpop.f32.mrb[12].mxu0 }
 0x83b   : > { %v1602_v47 = vmul.f32 %v2144_v45, %v1598_v46  ;;  %v2005_v48 = vpop.f32.mrb[13].mxu0 }
 0x83d   : > { %2009 = vmatmul.mubr.msk.f32.vlgmr.msra.gmra.mrb[14].mxu1 %vm721_vm2, %v1602_v47 }
 0x910   : > { %v1674_v49 = vpop.f32.mrb[14].mxu1 }
 0x911   : > { %v1678_v51 = vadd.f32 %v1674_v49, %v1437_v37  ;;  %v2010_v52 = vpop.f32.mrb[15].mxu1 }
 0x913   : > { %v1686_v53 = vadd.f32 %v1874_v50, %v1678_v51 }
 0x915   : > { %1687 = vst.msk [vmem:[%s469_s10] sm:$0xff] %vm484_vm1, %v1686_v53 }
 0x916   : > { %2330 = shalt.err (!%p2327_p6)
}
 0x917   : > { %s2331_s6 = scalar_lea.hbm %s2879_s26, 128  ;;  %s2335_s18 = scalar_lea.hbm %s2969_s22, 256 }
 0x918   : > { %p2332_p11 = scmp.ne.s32.totalorder %s2879_s26, %s2331_s6  ;;  %p2336_p12 = scmp.lt.u32.totalorder %s2879_s26, %s2969_s22 }
 0x919   : > { %p2337_p3 = scmp.lt.u32.totalorder %s2335_s18, %s2331_s6  ;;  %p2339_p0 = scmp.lt.u32.totalorder %s2331_s6, %s2879_s26 }
 0x91a   : > { %p2333_p1 = pnand %p2332_p11, %p2970_p2 }
 0x91b   : > { %p2338_p13 = por %p2337_p3, %p2336_p12 }
 0x91c   : > { %p2334_p9 = pneg %p2333_p1 }
 0x91d   : > { %p2340_p4 = por %p2339_p0, %p2338_p13 }
 0x91f   : > { %p2341_p10 = pnand %p2340_p4, %p2334_p9 }
 0x921   : > { %2344 = shalt.err (!%p2341_p10)
}
 0x922   : > { %2049 = dma.vmem_to_hbm [thread:$0]  (%p2970_p2), %s2881_s17, 128, %s2879_s26, %s1689_s21  }
 0x923 PF: > { %s1714_s20 = sand.u32 1, %s2387_s13   ;;  %p2971_p5 = scmp.ne.s32.totalorder %s2956_s12, 0 }
 0x924   : > { %p2972_p7 = scmp.ge.s32.totalorder %s2399_s16, 2  ;;  %s1715_s10 = scalar_lea.sflag [#allocation4], %s1714_s20 }
 0x926   : > { %p2072_p8 = pnand %p2972_p7, %p2971_p5 }
 0x928   : > { %2382 = dma.done.wait (!%p2072_p8), %s1715_s10, 128  }
 0x929   : > { %2384 = vsyncadd (!%p2072_p8), %s1715_s10, 4294967168  ;;  %p28_p6 = scmp.ge.s32.totalorder %s2623_s11, 4   ;;  %s2973_s13 = smov %s2391_s14 }
 0x92a   : > { %s2974_s14 = smov %s2395_s15  ;;  %s2975_s15 = smov %s2634_s29 }
 0x92b   : > { %s2976_s16 = smov %s2623_s11  ;;  %30 = sbr.rel (!%p28_p6) target bundleno = 16 (0x10), region = 137 }
 0x932   :  { %1720 = vsyncpa [#allocation3], 1 }
 0x933   :  { %1722 = vsyncpa [#allocation3 + $0x1], 1 }
 0x934   :  { %1723 = vsyncpa [#allocation6], 1 }
 0x935   :  { %1725 = vsyncpa [#allocation6 + $0x1], 1 }
 0x936   :  { %1726 = vsyncpa [#allocation9], 1 }
 0x937   :  { %1727 = vsyncpa [#allocation12], 1 }
 0x938   :  { %1728 = vsyncpa [#allocation4], 1 }
 0x939   :  { %1730 = vsyncpa [#allocation4 + $0x1], 1 }

</bundles_post_ra>
